<compile_context>
chip_gen: v6e
topology: v6e:2x2x1
jax: 0.10.0
libtpu: 0.0.40
codegen_flags: <defaults>
</compile_context>

<pallas_src>
import math

import jax
import jax.numpy as jnp
from jax.experimental import pallas as pl
from jax.experimental.pallas import tpu as pltpu


LANE = 128      # lane width for dense stores
SUBLANE = 8     # f32 sublane width


def _round_up(x, m):
    return ((x + m - 1) // m) * m


def _g(x):
    return jnp.where(x >= 0, x + 0.5, jax.nn.sigmoid(x))


def _vmem_limit_bytes():
    cap = 64 * 1024 * 1024
    try:
        info = pltpu.get_tpu_info()
        cap = int(getattr(info, "vmem_capacity_bytes", cap))
    except Exception:
        pass
    # ~75% of physical: ~48 MiB on v7x (64 MiB), ~96 MiB on v5e/v6e (128 MiB).
    return max(32 * 1024 * 1024, min(int(cap * 0.75), 100 * 1024 * 1024))


def _choose_seq_tile(S, B_pad, D_phys, H_pad, vmem_limit):
    """Timesteps per tile: bounded by a VMEM budget and a row target."""
    # per-timestep residency: x (bf16, 2 bufs) + out (bf16, 2 bufs) + ab scratch (f32)
    per_t = B_pad * (2 * 2 * D_phys + 2 * 2 * H_pad + 4 * 2 * H_pad)
    t_vmem = max(1, (vmem_limit // 2) // max(per_t, 1))
    t_rows = max(1, 512 // B_pad)
    return max(1, min(S, t_vmem, t_rows))


# ------------------------------- Pallas kernel ------------------------------ #

def _make_mingru_kernel(*, T, B_pad, H_pad, S, num_tiles, num_dirs, has_pad):
    """Fused fwd(+bwd) minGRU over one sequence tile.

    Kernel refs (per grid step (dir, j)):
      x_ref   : (T*B_pad, D)        time-major input rows for this tile (bf16)
      w_ref   : (D, 2*H_pad)        fused [Wz | Wh] for this direction (bf16)
      b_ref   : (1, 2*H_pad)        fused [bz | bh] (f32)
      h0_ref  : (B_pad, H_pad)      g(h_0) for this direction (f32)
      out_ref : (T*B_pad, H_pad)    hidden states for this tile (bf16)
      h_carry : VMEM (B_pad, H_pad) state carried across sequence tiles (f32)
      ab_buf  : VMEM (T*B_pad, 2*H_pad)  [a | b] = [1-z | z*h~] scan buffer (f32)
    """
    rows = T * B_pad

    def scan_step(ab_buf, d, reverse):
        n = (T - d) * B_pad
        off = d * B_pad
        lo = ab_buf[pl.ds(0, n), :]
        hi = ab_buf[pl.ds(off, n), :]
        a_lo, b_lo = lo[:, :H_pad], lo[:, H_pad:]
        a_hi, b_hi = hi[:, :H_pad], hi[:, H_pad:]
        if reverse:
            # backward-in-time: row t composes with row t+d
            ab_buf[pl.ds(0, n), :] = jnp.concatenate(
                [a_lo * a_hi, a_lo * b_hi + b_lo], axis=1)
        else:
            # forward-in-time: row t composes with row t-d
            ab_buf[pl.ds(off, n), :] = jnp.concatenate(
                [a_hi * a_lo, a_hi * b_lo + b_hi], axis=1)

    def kernel(x_ref, w_ref, b_ref, h0_ref, out_ref, h_carry, ab_buf):
        d_idx = pl.program_id(0)       # direction: 0 = forward, 1 = backward
        j = pl.program_id(1)           # serial scan over sequence tiles
        # forward visits tiles 0..n-1, backward visits n-1..0
        tile_in_seq = j + d_idx * (num_tiles - 1 - 2 * j)

        @pl.when(j == 0)
        def _init():
            h_carry[...] = h0_ref[...]

        # One fused MXU matmul for both gates (bf16 operands, f32 accumulate).
        gates = jnp.dot(x_ref[...], w_ref[...],
                        preferred_element_type=jnp.float32) + b_ref[...]
        z = jax.nn.sigmoid(gates[:, :H_pad])
        h_tilde = _g(gates[:, H_pad:])
        a = 1.0 - z
        b = z * h_tilde

        if has_pad:
            # Padded timesteps (t >= S) become the identity map (a=1, b=0) so the
            # carried state passes through them unchanged (both directions).
            row_ids = jax.lax.broadcasted_iota(jnp.int32, (rows, H_pad), 0)
            limit = (S - tile_in_seq * T) * B_pad
            valid = row_ids < limit
            a = jnp.where(valid, a, 1.0)
            b = jnp.where(valid, b, 0.0)

        ab_buf[...] = jnp.concatenate([a, b], axis=1)

        # Log-depth (Hillis-Steele) scan of affine maps h -> a*h + b along time.
        d_stride = 1
        while d_stride < T:
            if num_dirs == 1:
                scan_step(ab_buf, d_stride, reverse=False)
            else:
                @pl.when(d_idx == 0)
                def _(ds=d_stride):
                    scan_step(ab_buf, ds, reverse=False)

                @pl.when(d_idx == 1)
                def _(ds=d_stride):
                    scan_step(ab_buf, ds, reverse=True)
            d_stride *= 2

        ab = ab_buf[...]
        A = ab[:, :H_pad]
        Bv = ab[:, H_pad:]
        h_in = jnp.tile(h_carry[...], (T, 1))      # carry broadcast over timesteps
        h_all = A * h_in + Bv                      # whole-tile fused multiply-add
        out_ref[...] = h_all.astype(out_ref.dtype)

        if num_dirs == 1:
            h_carry[...] = h_all[(T - 1) * B_pad:, :]
        else:
            @pl.when(d_idx == 0)
            def _():
                h_carry[...] = h_all[(T - 1) * B_pad:, :]

            @pl.when(d_idx == 1)
            def _():
                h_carry[...] = h_all[:B_pad, :]

    return kernel


def _mingru_layer(x2d, w_stack, b_stack, h0_stack, *, S, B_pad, H_pad, T, num_dirs):
    """One (optionally bidirectional) minGRU layer.

    x2d      : (S_pad*B_pad, D_phys) bf16, row = t*B_pad + b (time-major)
    w_stack  : (num_dirs, D_phys, 2*H_pad) bf16
    b_stack  : (num_dirs, 1, 2*H_pad) f32
    h0_stack : (num_dirs, B_pad, H_pad) f32  (already g(h_0))
    returns  : (S_pad*B_pad, num_dirs*H_pad) bf16
    """
    rows_total, D_phys = x2d.shape
    num_tiles = rows_total // (T * B_pad)
    has_pad = (num_tiles * T) != S

    kernel = _make_mingru_kernel(T=T, B_pad=B_pad, H_pad=H_pad, S=S,
                                 num_tiles=num_tiles, num_dirs=num_dirs,
                                 has_pad=has_pad)

    def tile_idx(d, j):
        # d == 0 -> j ; d == 1 -> num_tiles - 1 - j
        return j + d * (num_tiles - 1 - 2 * j)

    grid_spec = pltpu.PrefetchScalarGridSpec(
        num_scalar_prefetch=0,
        grid=(num_dirs, num_tiles),
        in_specs=[
            pl.BlockSpec((T * B_pad, D_phys), lambda d, j: (tile_idx(d, j), 0)),
            # TODO(synk): pipeline_mode=pl.Buffered(1) on the grid-invariant W/b/h0
            # blocks would reclaim their second VMEM buffer; left default for safety.
            pl.BlockSpec((None, D_phys, 2 * H_pad), lambda d, j: (d, 0, 0)),
            pl.BlockSpec((None, 1, 2 * H_pad), lambda d, j: (d, 0, 0)),
            pl.BlockSpec((None, B_pad, H_pad), lambda d, j: (d, 0, 0)),
        ],
        out_specs=pl.BlockSpec((T * B_pad, H_pad),
                               lambda d, j: (tile_idx(d, j), d)),
        scratch_shapes=[
            pltpu.VMEM((B_pad, H_pad), jnp.float32),            # carried hidden state
            pltpu.VMEM((T * B_pad, 2 * H_pad), jnp.float32),    # [1-z | z*h~] scan buf
        ],
    )

    M = rows_total
    cost = pl.CostEstimate(
        flops=num_dirs * (2 * M * D_phys * 2 * H_pad + 14 * M * H_pad),
        transcendentals=num_dirs * 3 * M * H_pad,
        bytes_accessed=num_dirs * 2 * (M * D_phys + D_phys * 2 * H_pad + M * H_pad)
        + num_dirs * 4 * (2 * H_pad + B_pad * H_pad),
    )

    return pl.pallas_call(
        kernel,
        grid_spec=grid_spec,
        out_shape=jax.ShapeDtypeStruct((rows_total, num_dirs * H_pad), jnp.bfloat16),
        compiler_params=pltpu.CompilerParams(
            dimension_semantics=("parallel", "arbitrary"),
            vmem_limit_bytes=_vmem_limit_bytes(),
        ),
        cost_estimate=cost,
    )(x2d, w_stack, b_stack, h0_stack)


# ------------------------------ Parameter init ------------------------------ #

def _xavier_uniform(key, fan_in, fan_out):
    bound = math.sqrt(6.0 / (fan_in + fan_out))
    return jax.random.uniform(key, (fan_in, fan_out), jnp.float32, -bound, bound)


def init_mingru_params(key, input_size, hidden_size):
    k1, k2 = jax.random.split(key)
    wz = _xavier_uniform(k1, input_size, hidden_size)
    wh = _xavier_uniform(k2, input_size, hidden_size)
    return {
        "w": jnp.concatenate([wz, wh], axis=1),               # (D, 2H) fused [Wz|Wh]
        "b": jnp.zeros((1, 2 * hidden_size), jnp.float32),    # (1, 2H) fused
    }


def init_wrapped_params(key, input_size, hidden_size, num_layers, bidirectional):
    nd = 2 if bidirectional else 1
    layers = []
    for layer in range(num_layers):
        layer_in = input_size if layer == 0 else hidden_size * nd
        if bidirectional:
            key, kf, kb = jax.random.split(key, 3)
            layers.append({
                "fwd": init_mingru_params(kf, layer_in, hidden_size),
                "bwd": init_mingru_params(kb, layer_in, hidden_size),
            })
        else:
            key, kf = jax.random.split(key)
            layers.append(init_mingru_params(kf, layer_in, hidden_size))
    return layers


def _pack_layer(dir_params, row_map, D_phys, H, H_pad):
    """Embed logical (D_log, 2H) fused weights into the padded physical layout."""
    w_blocks, b_blocks = [], []
    for p in dir_params:
        w, b = p["w"], p["b"]
        wz, wh = w[:, :H], w[:, H:]
        wz_p = jnp.zeros((D_phys, H_pad), jnp.float32).at[row_map, :H].set(wz)
        wh_p = jnp.zeros((D_phys, H_pad), jnp.float32).at[row_map, :H].set(wh)
        w_blocks.append(jnp.concatenate([wz_p, wh_p], axis=1))
        b_p = jnp.zeros((1, 2 * H_pad), jnp.float32)
        b_p = b_p.at[:, :H].set(b[:, :H]).at[:, H_pad:H_pad + H].set(b[:, H:])
        b_blocks.append(b_p)
    w_stack = jnp.stack(w_blocks, axis=0).astype(jnp.bfloat16)   # (nd, D_phys, 2H_pad)
    b_stack = jnp.stack(b_blocks, axis=0)                        # (nd, 1, 2H_pad)
    return w_stack, b_stack


# ---------------------------- Stacked forward pass --------------------------- #

def wrapped_mingru_forward(params, x, h_0=None, *, hidden_size, num_layers,
                           bidirectional, batch_first=True, seq_tile=None):
    """Eval-mode stacked / bidirectional minGRU forward.

    x  : (B, S, D) if batch_first else (S, B, D)
    h_0: (num_layers * num_directions, B, H) or None
    returns (output, h_n)
    """
    if not batch_first:
        x = jnp.transpose(x, (1, 0, 2))
    B, S, D_in = x.shape
    H = hidden_size
    nd = 2 if bidirectional else 1
    H_pad = _round_up(max(H, 1), LANE)
    B_pad = _round_up(max(B, 1), SUBLANE)

    if h_0 is None:
        h_0 = jnp.zeros((num_layers * nd, B, H), jnp.float32)
    h0_g = _g(h_0.reshape(num_layers, nd, B, H).astype(jnp.float32))
    h0_g = jnp.pad(h0_g, ((0, 0), (0, 0), (0, B_pad - B), (0, H_pad - H)))

    vmem_limit = _vmem_limit_bytes()
    D_phys_max = max(D_in, nd * H_pad)
    T = int(seq_tile) if seq_tile is not None else _choose_seq_tile(
        S, B_pad, D_phys_max, H_pad, vmem_limit)
    T = max(1, min(T, S))
    if (T * B_pad) % 16:        # keep bf16 blocks sublane-tile aligned
        T += 1
    num_tiles = pl.cdiv(S, T)
    S_pad = num_tiles * T

    # One transpose to time-major; batch padded to sublanes, sequence to the tile.
    xt = jnp.transpose(x, (1, 0, 2)).astype(jnp.float32)
    xt = jnp.pad(xt, ((0, S_pad - S), (0, B_pad - B), (0, 0)))
    layer_in = xt.reshape(S_pad * B_pad, D_in).astype(jnp.bfloat16)

    h_n = []
    out2d = layer_in
    for layer in range(num_layers):
        dirs = ([params[layer]["fwd"], params[layer]["bwd"]]
                if bidirectional else [params[layer]])
        if layer == 0:
            row_map = jnp.arange(D_in)
            D_phys = D_in
        else:
            row_map = jnp.concatenate(
                [jnp.arange(H) + dprev * H_pad for dprev in range(nd)])
            D_phys = nd * H_pad
        w_stack, b_stack = _pack_layer(dirs, row_map, D_phys, H, H_pad)
        out2d = _mingru_layer(layer_in, w_stack, b_stack, h0_g[layer],
                              S=S, B_pad=B_pad, H_pad=H_pad, T=T, num_dirs=nd)
        h_n.append(out2d[(S - 1) * B_pad:(S - 1) * B_pad + B, :H]
                   .astype(jnp.float32))
        if bidirectional:
            h_n.append(out2d[:B, H_pad:H_pad + H].astype(jnp.float32))
        layer_in = out2d

    h_n = jnp.stack(h_n, axis=0)                                  # (L*nd, B, H)
    out = out2d.reshape(S_pad, B_pad, nd * H_pad)[:S, :B]
    out = jnp.concatenate([out[..., d * H_pad:d * H_pad + H] for d in range(nd)],
                          axis=-1)
    out = jnp.transpose(out, (1, 0, 2)).astype(jnp.float32)       # (B, S, nd*H)
    if not batch_first:
        out = jnp.transpose(out, (1, 0, 2))
    return out, h_n


# ----------------------------- Pure-JAX reference ---------------------------- #

def _mingru_cell_ref(x, w, b, h0):
    """Mirrors kernel numerics: bf16 matmul operands, f32 epilogue/scan, bf16 output."""
    H = w.shape[1] // 2
    gates = jnp.dot(x.astype(jnp.bfloat16), w.astype(jnp.bfloat16),
                    preferred_element_type=jnp.float32) + b[0]
    z = jax.nn.sigmoid(gates[..., :H])
    h_tilde = _g(gates[..., H:])
    h_prev = _g(h0)
    outs = []
    for t in range(x.shape[1]):
        h_prev = (1.0 - z[:, t]) * h_prev + z[:, t] * h_tilde[:, t]
        outs.append(h_prev)
    h = jnp.stack(outs, axis=1)
    return h.astype(jnp.bfloat16).astype(jnp.float32)


def _wrapped_ref(params, x, hidden_size, num_layers, bidirectional):
    B, S, _ = x.shape
    nd = 2 if bidirectional else 1
    h0 = jnp.zeros((num_layers, nd, B, hidden_size), jnp.float32)
    layer_output = x
    h_n = []
    for l in range(num_layers):
        if bidirectional:
            pf, pb = params[l]["fwd"], params[l]["bwd"]
            h_fwd = _mingru_cell_ref(layer_output, pf["w"], pf["b"], h0[l, 0])
            h_bwd = _mingru_cell_ref(jnp.flip(layer_output, 1), pb["w"], pb["b"],
                                     h0[l, 1])
            h_bwd = jnp.flip(h_bwd, 1)
            layer_output = jnp.concatenate([h_fwd, h_bwd], axis=2)
            h_n.append(h_fwd[:, -1, :])
            h_n.append(h_bwd[:, 0, :])
        else:
            p = params[l]
            h_fwd = _mingru_cell_ref(layer_output, p["w"], p["b"], h0[l, 0])
            layer_output = h_fwd
            h_n.append(h_fwd[:, -1, :])
    return layer_output, jnp.stack(h_n, 0)


# ------------------------------------ Main ----------------------------------- #

if __name__ == "__main__":
    def run_case(input_size, hidden_size, num_layers, bidirectional, batch, seq,
                 seq_tile):
        key = jax.random.PRNGKey(0)
        kp, kx = jax.random.split(key)
        params = init_wrapped_params(kp, input_size, hidden_size, num_layers,
                                     bidirectional)
        x = jax.random.normal(kx, (batch, seq, input_size), jnp.float32)

        out, h_n = wrapped_mingru_forward(
            params, x, None, hidden_size=hidden_size, num_layers=num_layers,
            bidirectional=bidirectional, batch_first=True, seq_tile=seq_tile)
        out = jax.block_until_ready(out)
        h_n = jax.block_until_ready(h_n)

        nd = 2 if bidirectional else 1
        assert out.shape == (batch, seq, nd * hidden_size)
        assert h_n.shape == (num_layers * nd, batch, hidden_size)

        ref_out, ref_hn = _wrapped_ref(params, x, hidden_size, num_layers,
                                       bidirectional)
        # tolerance: outputs stored in bf16 (one bf16 ulp near rounding boundaries)
        assert jnp.allclose(out, ref_out, rtol=2e-2, atol=2e-2), \
            float(jnp.max(jnp.abs(out - ref_out)))
        assert jnp.allclose(h_n, ref_hn, rtol=2e-2, atol=2e-2), \
            float(jnp.max(jnp.abs(h_n - ref_hn)))

    # bidirectional, 2 layers, multi-tile sequence (carried state across tiles)
    run_case(16, 32, 2, True, 2, 8, 4)
    # ragged sequence (S=6 padded to 8): exercises the identity-masked tail
    run_case(16, 32, 2, True, 2, 6, 4)
    # unidirectional (== minGRU.forward_sequence_inference), auto tile choice
    run_case(16, 32, 1, False, 2, 8, None)

    print("KERNEL_OK")
</pallas_src>

<mosaic_0001>
module attributes {stable_mosaic.version = 11 : i64} {
  func.func @kernel(%arg0: i32, %arg1: i32, %arg2: memref<32x16xbf16, #tpu.memory_space<vmem>>, %arg3: memref<1x16x256xbf16, #tpu.memory_space<vmem>>, %arg4: memref<1x1x256xf32, #tpu.memory_space<vmem>>, %arg5: memref<1x8x128xf32, #tpu.memory_space<vmem>>, %arg6: memref<32x128xbf16, #tpu.memory_space<vmem>>, %arg7: memref<8x128xf32, #tpu.memory_space<vmem>>, %arg8: memref<32x256xf32, #tpu.memory_space<vmem>>) attributes {dimension_semantics = [#tpu.dimension_semantics<parallel>, #tpu.dimension_semantics<arbitrary>], iteration_bounds = array<i64: 2, 2>, scalar_prefetch = 0 : i64, scratch_operands = 2 : i64, tpu.core_type = #tpu.core_type<tc>, window_params = [{transform_indices = @transform_0, window_bounds = array<i64: 32, 16>}, {transform_indices = @transform_1, window_bounds = array<i64: 1, 16, 256>}, {transform_indices = @transform_2, window_bounds = array<i64: 1, 1, 256>}, {transform_indices = @transform_3, window_bounds = array<i64: 1, 8, 128>}, {transform_indices = @transform_4, window_bounds = array<i64: 32, 128>}]} {
    %c0_i32 = arith.constant 0 : i32
    %0 = arith.cmpi eq, %arg1, %c0_i32 : i32
    %1 = arith.extui %0 : i1 to i32
    %c0_i32_0 = arith.constant 0 : i32
    %2 = arith.cmpi ne, %1, %c0_i32_0 : i32
    scf.if %2 {
      %c0_32 = arith.constant 0 : index
      %c0_33 = arith.constant 0 : index
      %c0_34 = arith.constant 0 : index
      %60 = vector.load %arg5[%c0_32, %c0_33, %c0_34] : memref<1x8x128xf32, #tpu.memory_space<vmem>>, vector<1x8x128xf32>
      %61 = vector.shape_cast %60 : vector<1x8x128xf32> to vector<8x128xf32>
      %c0_35 = arith.constant 0 : index
      %c0_36 = arith.constant 0 : index
      %62 = vector.load %arg7[%c0_35, %c0_36] : memref<8x128xf32, #tpu.memory_space<vmem>>, vector<8x128xf32>
      tpu.vector_store %arg7[%c0_35, %c0_36], %61 {strides = array<i32>} : memref<8x128xf32, #tpu.memory_space<vmem>>, vector<8x128xf32>,
    } else {
    }
    %c0 = arith.constant 0 : index
    %c0_1 = arith.constant 0 : index
    %3 = vector.load %arg2[%c0, %c0_1] : memref<32x16xbf16, #tpu.memory_space<vmem>>, vector<32x16xbf16>
    %c0_2 = arith.constant 0 : index
    %c0_3 = arith.constant 0 : index
    %c0_4 = arith.constant 0 : index
    %4 = vector.load %arg3[%c0_2, %c0_3, %c0_4] : memref<1x16x256xbf16, #tpu.memory_space<vmem>>, vector<1x16x256xbf16>
    %5 = vector.shape_cast %4 : vector<1x16x256xbf16> to vector<16x256xbf16>
    %cst = arith.constant dense<0.000000e+00> : vector<32x256xf32>
    %6 = tpu.matmul %3, %5, %cst {dimension_numbers = #tpu.dot_dimension_numbers<[1], [0], [0], [1], [0, 0, 1, 1], [], []>} : vector<32x16xbf16>, vector<16x256xbf16>, vector<32x256xf32> -> vector<32x256xf32>
    %c0_5 = arith.constant 0 : index
    %c0_6 = arith.constant 0 : index
    %c0_7 = arith.constant 0 : index
    %7 = vector.load %arg4[%c0_5, %c0_6, %c0_7] : memref<1x1x256xf32, #tpu.memory_space<vmem>>, vector<1x1x256xf32>
    %8 = vector.shape_cast %7 : vector<1x1x256xf32> to vector<1x256xf32>
    %9 = vector.broadcast %8 : vector<1x256xf32> to vector<32x256xf32>
    %10 = arith.addf %6, %9 : vector<32x256xf32>
    %11 = vector.extract_strided_slice %10 {offsets = [0, 0], sizes = [32, 128], strides = [1, 1]} : vector<32x256xf32> to vector<32x128xf32>
    %12 = arith.negf %11 : vector<32x128xf32>
    %13 = math.exp %12 : vector<32x128xf32>
    %cst_8 = arith.constant 1.000000e+00 : f32
    %14 = vector.broadcast %cst_8 : f32 to vector<32x128xf32>
    %15 = arith.addf %14, %13 : vector<32x128xf32>
    %16 = arith.divf %14, %15 : vector<32x128xf32>
    %17 = vector.extract_strided_slice %10 {offsets = [0, 128], sizes = [32, 128], strides = [1, 1]} : vector<32x256xf32> to vector<32x128xf32>
    %cst_9 = arith.constant 0.000000e+00 : f32
    %18 = vector.broadcast %cst_9 : f32 to vector<32x128xf32>
    %19 = arith.cmpf oge, %17, %18 : vector<32x128xf32>
    %cst_10 = arith.constant 5.000000e-01 : f32
    %20 = vector.broadcast %cst_10 : f32 to vector<32x128xf32>
    %21 = arith.addf %17, %20 : vector<32x128xf32>
    %22 = arith.negf %17 : vector<32x128xf32>
    %23 = math.exp %22 : vector<32x128xf32>
    %cst_11 = arith.constant 1.000000e+00 : f32
    %24 = vector.broadcast %cst_11 : f32 to vector<32x128xf32>
    %25 = arith.addf %24, %23 : vector<32x128xf32>
    %26 = arith.divf %24, %25 : vector<32x128xf32>
    %27 = arith.select %19, %21, %26 : vector<32x128xi1>, vector<32x128xf32>
    %cst_12 = arith.constant 1.000000e+00 : f32
    %28 = vector.broadcast %cst_12 : f32 to vector<32x128xf32>
    %29 = arith.subf %28, %16 : vector<32x128xf32>
    %30 = arith.mulf %16, %27 : vector<32x128xf32>
    %31 = tpu.concatenate %29, %30 in 1 : vector<32x128xf32>, vector<32x128xf32> -> vector<32x256xf32>
    %c0_13 = arith.constant 0 : index
    %c0_14 = arith.constant 0 : index
    %32 = vector.load %arg8[%c0_13, %c0_14] : memref<32x256xf32, #tpu.memory_space<vmem>>, vector<32x256xf32>
    tpu.vector_store %arg8[%c0_13, %c0_14], %31 {strides = array<i32>} : memref<32x256xf32, #tpu.memory_space<vmem>>, vector<32x256xf32>,
    %c0_i32_15 = arith.constant 0 : i32
    %33 = arith.cmpi eq, %arg0, %c0_i32_15 : i32
    %34 = arith.extui %33 : i1 to i32
    %c0_i32_16 = arith.constant 0 : i32
    %35 = arith.cmpi ne, %34, %c0_i32_16 : i32
    scf.if %35 {
      %c0_32 = arith.constant 0 : index
      %c0_33 = arith.constant 0 : index
      %60 = vector.load %arg8[%c0_32, %c0_33] : memref<32x256xf32, #tpu.memory_space<vmem>>, vector<24x256xf32>
      %c8 = arith.constant 8 : index
      %c0_34 = arith.constant 0 : index
      %61 = vector.load %arg8[%c8, %c0_34] : memref<32x256xf32, #tpu.memory_space<vmem>>, vector<24x256xf32>
      %62 = vector.extract_strided_slice %60 {offsets = [0, 0], sizes = [24, 128], strides = [1, 1]} : vector<24x256xf32> to vector<24x128xf32>
      %63 = vector.extract_strided_slice %60 {offsets = [0, 128], sizes = [24, 128], strides = [1, 1]} : vector<24x256xf32> to vector<24x128xf32>
      %64 = vector.extract_strided_slice %61 {offsets = [0, 0], sizes = [24, 128], strides = [1, 1]} : vector<24x256xf32> to vector<24x128xf32>
      %65 = vector.extract_strided_slice %61 {offsets = [0, 128], sizes = [24, 128], strides = [1, 1]} : vector<24x256xf32> to vector<24x128xf32>
      %66 = arith.mulf %64, %62 : vector<24x128xf32>
      %67 = arith.mulf %64, %63 : vector<24x128xf32>
      %68 = arith.addf %67, %65 : vector<24x128xf32>
      %69 = tpu.concatenate %66, %68 in 1 : vector<24x128xf32>, vector<24x128xf32> -> vector<24x256xf32>
      %c8_35 = arith.constant 8 : index
      %c0_36 = arith.constant 0 : index
      %70 = vector.load %arg8[%c8_35, %c0_36] : memref<32x256xf32, #tpu.memory_space<vmem>>, vector<24x256xf32>
      tpu.vector_store %arg8[%c8_35, %c0_36], %69 {strides = array<i32>} : memref<32x256xf32, #tpu.memory_space<vmem>>, vector<24x256xf32>,
    } else {
    }
    %c1_i32 = arith.constant 1 : i32
    %36 = arith.cmpi eq, %arg0, %c1_i32 : i32
    %37 = arith.extui %36 : i1 to i32
    %c0_i32_17 = arith.constant 0 : i32
    %38 = arith.cmpi ne, %37, %c0_i32_17 : i32
    scf.if %38 {
      %c0_32 = arith.constant 0 : index
      %c0_33 = arith.constant 0 : index
      %60 = vector.load %arg8[%c0_32, %c0_33] : memref<32x256xf32, #tpu.memory_space<vmem>>, vector<24x256xf32>
      %c8 = arith.constant 8 : index
      %c0_34 = arith.constant 0 : index
      %61 = vector.load %arg8[%c8, %c0_34] : memref<32x256xf32, #tpu.memory_space<vmem>>, vector<24x256xf32>
      %62 = vector.extract_strided_slice %60 {offsets = [0, 0], sizes = [24, 128], strides = [1, 1]} : vector<24x256xf32> to vector<24x128xf32>
      %63 = vector.extract_strided_slice %60 {offsets = [0, 128], sizes = [24, 128], strides = [1, 1]} : vector<24x256xf32> to vector<24x128xf32>
      %64 = vector.extract_strided_slice %61 {offsets = [0, 0], sizes = [24, 128], strides = [1, 1]} : vector<24x256xf32> to vector<24x128xf32>
      %65 = vector.extract_strided_slice %61 {offsets = [0, 128], sizes = [24, 128], strides = [1, 1]} : vector<24x256xf32> to vector<24x128xf32>
      %66 = arith.mulf %62, %64 : vector<24x128xf32>
      %67 = arith.mulf %62, %65 : vector<24x128xf32>
      %68 = arith.addf %67, %63 : vector<24x128xf32>
      %69 = tpu.concatenate %66, %68 in 1 : vector<24x128xf32>, vector<24x128xf32> -> vector<24x256xf32>
      %c0_35 = arith.constant 0 : index
      %c0_36 = arith.constant 0 : index
      %70 = vector.load %arg8[%c0_35, %c0_36] : memref<32x256xf32, #tpu.memory_space<vmem>>, vector<24x256xf32>
      tpu.vector_store %arg8[%c0_35, %c0_36], %69 {strides = array<i32>} : memref<32x256xf32, #tpu.memory_space<vmem>>, vector<24x256xf32>,
    } else {
    }
    %c0_i32_18 = arith.constant 0 : i32
    %39 = arith.cmpi eq, %arg0, %c0_i32_18 : i32
    %40 = arith.extui %39 : i1 to i32
    %c0_i32_19 = arith.constant 0 : i32
    %41 = arith.cmpi ne, %40, %c0_i32_19 : i32
    scf.if %41 {
      %c0_32 = arith.constant 0 : index
      %c0_33 = arith.constant 0 : index
      %60 = vector.load %arg8[%c0_32, %c0_33] : memref<32x256xf32, #tpu.memory_space<vmem>>, vector<16x256xf32>
      %c16 = arith.constant 16 : index
      %c0_34 = arith.constant 0 : index
      %61 = vector.load %arg8[%c16, %c0_34] : memref<32x256xf32, #tpu.memory_space<vmem>>, vector<16x256xf32>
      %62 = vector.extract_strided_slice %60 {offsets = [0, 0], sizes = [16, 128], strides = [1, 1]} : vector<16x256xf32> to vector<16x128xf32>
      %63 = vector.extract_strided_slice %60 {offsets = [0, 128], sizes = [16, 128], strides = [1, 1]} : vector<16x256xf32> to vector<16x128xf32>
      %64 = vector.extract_strided_slice %61 {offsets = [0, 0], sizes = [16, 128], strides = [1, 1]} : vector<16x256xf32> to vector<16x128xf32>
      %65 = vector.extract_strided_slice %61 {offsets = [0, 128], sizes = [16, 128], strides = [1, 1]} : vector<16x256xf32> to vector<16x128xf32>
      %66 = arith.mulf %64, %62 : vector<16x128xf32>
      %67 = arith.mulf %64, %63 : vector<16x128xf32>
      %68 = arith.addf %67, %65 : vector<16x128xf32>
      %69 = tpu.concatenate %66, %68 in 1 : vector<16x128xf32>, vector<16x128xf32> -> vector<16x256xf32>
      %c16_35 = arith.constant 16 : index
      %c0_36 = arith.constant 0 : index
      %70 = vector.load %arg8[%c16_35, %c0_36] : memref<32x256xf32, #tpu.memory_space<vmem>>, vector<16x256xf32>
      tpu.vector_store %arg8[%c16_35, %c0_36], %69 {strides = array<i32>} : memref<32x256xf32, #tpu.memory_space<vmem>>, vector<16x256xf32>,
    } else {
    }
    %c1_i32_20 = arith.constant 1 : i32
    %42 = arith.cmpi eq, %arg0, %c1_i32_20 : i32
    %43 = arith.extui %42 : i1 to i32
    %c0_i32_21 = arith.constant 0 : i32
    %44 = arith.cmpi ne, %43, %c0_i32_21 : i32
    scf.if %44 {
      %c0_32 = arith.constant 0 : index
      %c0_33 = arith.constant 0 : index
      %60 = vector.load %arg8[%c0_32, %c0_33] : memref<32x256xf32, #tpu.memory_space<vmem>>, vector<16x256xf32>
      %c16 = arith.constant 16 : index
      %c0_34 = arith.constant 0 : index
      %61 = vector.load %arg8[%c16, %c0_34] : memref<32x256xf32, #tpu.memory_space<vmem>>, vector<16x256xf32>
      %62 = vector.extract_strided_slice %60 {offsets = [0, 0], sizes = [16, 128], strides = [1, 1]} : vector<16x256xf32> to vector<16x128xf32>
      %63 = vector.extract_strided_slice %60 {offsets = [0, 128], sizes = [16, 128], strides = [1, 1]} : vector<16x256xf32> to vector<16x128xf32>
      %64 = vector.extract_strided_slice %61 {offsets = [0, 0], sizes = [16, 128], strides = [1, 1]} : vector<16x256xf32> to vector<16x128xf32>
      %65 = vector.extract_strided_slice %61 {offsets = [0, 128], sizes = [16, 128], strides = [1, 1]} : vector<16x256xf32> to vector<16x128xf32>
      %66 = arith.mulf %62, %64 : vector<16x128xf32>
      %67 = arith.mulf %62, %65 : vector<16x128xf32>
      %68 = arith.addf %67, %63 : vector<16x128xf32>
      %69 = tpu.concatenate %66, %68 in 1 : vector<16x128xf32>, vector<16x128xf32> -> vector<16x256xf32>
      %c0_35 = arith.constant 0 : index
      %c0_36 = arith.constant 0 : index
      %70 = vector.load %arg8[%c0_35, %c0_36] : memref<32x256xf32, #tpu.memory_space<vmem>>, vector<16x256xf32>
      tpu.vector_store %arg8[%c0_35, %c0_36], %69 {strides = array<i32>} : memref<32x256xf32, #tpu.memory_space<vmem>>, vector<16x256xf32>,
    } else {
    }
    %c0_22 = arith.constant 0 : index
    %c0_23 = arith.constant 0 : index
    %45 = vector.load %arg8[%c0_22, %c0_23] : memref<32x256xf32, #tpu.memory_space<vmem>>, vector<32x256xf32>
    %46 = vector.extract_strided_slice %45 {offsets = [0, 0], sizes = [32, 128], strides = [1, 1]} : vector<32x256xf32> to vector<32x128xf32>
    %47 = vector.extract_strided_slice %45 {offsets = [0, 128], sizes = [32, 128], strides = [1, 1]} : vector<32x256xf32> to vector<32x128xf32>
    %c0_24 = arith.constant 0 : index
    %c0_25 = arith.constant 0 : index
    %48 = vector.load %arg7[%c0_24, %c0_25] : memref<8x128xf32, #tpu.memory_space<vmem>>, vector<8x128xf32>
    %49 = tpu.concatenate %48, %48, %48, %48 in 0 : vector<8x128xf32>, vector<8x128xf32>, vector<8x128xf32>, vector<8x128xf32> -> vector<32x128xf32>
    %50 = arith.mulf %46, %49 : vector<32x128xf32>
    %51 = arith.addf %50, %47 : vector<32x128xf32>
    %52 = arith.truncf %51 : vector<32x128xf32> to vector<32x128xbf16>
    %c0_26 = arith.constant 0 : index
    %c0_27 = arith.constant 0 : index
    %53 = vector.load %arg6[%c0_26, %c0_27] : memref<32x128xbf16, #tpu.memory_space<vmem>>, vector<32x128xbf16>
    tpu.vector_store %arg6[%c0_26, %c0_27], %52 {strides = array<i32>} : memref<32x128xbf16, #tpu.memory_space<vmem>>, vector<32x128xbf16>,
    %c0_i32_28 = arith.constant 0 : i32
    %54 = arith.cmpi eq, %arg0, %c0_i32_28 : i32
    %55 = arith.extui %54 : i1 to i32
    %c0_i32_29 = arith.constant 0 : i32
    %56 = arith.cmpi ne, %55, %c0_i32_29 : i32
    scf.if %56 {
      %60 = vector.extract_strided_slice %51 {offsets = [24, 0], sizes = [8, 128], strides = [1, 1]} : vector<32x128xf32> to vector<8x128xf32>
      %c0_32 = arith.constant 0 : index
      %c0_33 = arith.constant 0 : index
      %61 = vector.load %arg7[%c0_32, %c0_33] : memref<8x128xf32, #tpu.memory_space<vmem>>, vector<8x128xf32>
      tpu.vector_store %arg7[%c0_32, %c0_33], %60 {strides = array<i32>} : memref<8x128xf32, #tpu.memory_space<vmem>>, vector<8x128xf32>,
    } else {
    }
    %c1_i32_30 = arith.constant 1 : i32
    %57 = arith.cmpi eq, %arg0, %c1_i32_30 : i32
    %58 = arith.extui %57 : i1 to i32
    %c0_i32_31 = arith.constant 0 : i32
    %59 = arith.cmpi ne, %58, %c0_i32_31 : i32
    scf.if %59 {
      %60 = vector.extract_strided_slice %51 {offsets = [0, 0], sizes = [8, 128], strides = [1, 1]} : vector<32x128xf32> to vector<8x128xf32>
      %c0_32 = arith.constant 0 : index
      %c0_33 = arith.constant 0 : index
      %61 = vector.load %arg7[%c0_32, %c0_33] : memref<8x128xf32, #tpu.memory_space<vmem>>, vector<8x128xf32>
      tpu.vector_store %arg7[%c0_32, %c0_33], %60 {strides = array<i32>} : memref<8x128xf32, #tpu.memory_space<vmem>>, vector<8x128xf32>,
    } else {
    }
    return
  }
  func.func @transform_0(%arg0: i32, %arg1: i32) -> (i32, i32) {
    %c2_i32 = arith.constant 2 : i32
    %0 = arith.muli %c2_i32, %arg1 : i32
    %c1_i32 = arith.constant 1 : i32
    %1 = arith.subi %c1_i32, %0 : i32
    %2 = arith.muli %arg0, %1 : i32
    %3 = arith.addi %arg1, %2 : i32
    %c0_i32 = arith.constant 0 : i32
    %c0_i32_0 = arith.constant 0 : i32
    return %3, %c0_i32 : i32, i32
  }
  func.func @transform_1(%arg0: i32, %arg1: i32) -> (i32, i32, i32) {
    %c0_i32 = arith.constant 0 : i32
    %c0_i32_0 = arith.constant 0 : i32
    %c0_i32_1 = arith.constant 0 : i32
    return %arg0, %c0_i32, %c0_i32_0 : i32, i32, i32
  }
  func.func @transform_2(%arg0: i32, %arg1: i32) -> (i32, i32, i32) {
    %c0_i32 = arith.constant 0 : i32
    %c0_i32_0 = arith.constant 0 : i32
    %c0_i32_1 = arith.constant 0 : i32
    return %arg0, %c0_i32, %c0_i32_0 : i32, i32, i32
  }
  func.func @transform_3(%arg0: i32, %arg1: i32) -> (i32, i32, i32) {
    %c0_i32 = arith.constant 0 : i32
    %c0_i32_0 = arith.constant 0 : i32
    %c0_i32_1 = arith.constant 0 : i32
    return %arg0, %c0_i32, %c0_i32_0 : i32, i32, i32
  }
  func.func @transform_4(%arg0: i32, %arg1: i32) -> (i32, i32) {
    %c2_i32 = arith.constant 2 : i32
    %0 = arith.muli %c2_i32, %arg1 : i32
    %c1_i32 = arith.constant 1 : i32
    %1 = arith.subi %c1_i32, %0 : i32
    %2 = arith.muli %arg0, %1 : i32
    %3 = arith.addi %arg1, %2 : i32
    %c0_i32 = arith.constant 0 : i32
    return %3, %arg0 : i32, i32
  }
}

</mosaic_0001>

<bundles_post_ra>
// kernel: tpu_custom_call.1
= control target key start
LH: loop header
LB: loop body
LE: loop exit
PB: predicated region body
PF: predicated region fallthrough
CT: control target
= control target key end

     0   :  { %s1455_s0 = inlined_call_operand.vmem [shape: bf16[64,16], index: 0, kind: input, shape index: {}]   ;;  %s1456_s1 = inlined_call_operand.vmem [shape: bf16[2,16,256], index: 1, kind: input, shape index: {}]   ;;  %s1457_s2 = inlined_call_operand.vmem [shape: f32[2,1,256], index: 2, kind: input, shape index: {}]   ;;  %s1458_s3 = inlined_call_operand.hbm [shape: f32[2,8,128], index: 3, kind: input, shape index: {}]   ;;  %s1459_s4 = inlined_call_operand.hbm [shape: bf16[64,256], index: 4, kind: output, shape index: {}]  }
   0x1   :  { %1468 = sst [smem:[#allocation16_spill]] %s1455_s0 }
   0x2   :  { %1469 = sst [smem:[#allocation17_spill]] %s1457_s2 }
   0x3   :  { %1470 = sst [smem:[#allocation18_spill]] %s1458_s3 }
   0x4   :  { %1471 = sst [smem:[#allocation19_spill]] %s1459_s4 }
   0x5   :  { %9 = vsyncpa [#allocation5], 0 }
   0x6   :  { %11 = vsyncpa [#allocation5 + $0x1], 0 }
   0x7   :  { %12 = vsyncpa [#allocation6], 0 }
   0x8   :  { %14 = vsyncpa [#allocation6 + $0x1], 0  ;;  %s1194_s15 = smov 0   ;;  %s1196_s16 = smov 0  }
   0x9   :  { %s1198_s17 = smov 0   ;;  %s1200_s18 = smov 0  }
   0xa   :  { %s1202_s19 = smov 0   ;;  %s1204_s20 = smov 0  }
   0xb   :  { %s1206_s21 = smov 0   ;;  %s1208_s22 = smov 0  }
   0xc   :  { %s1210_s23 = smov 0   ;;  %s1212_s24 = smov 0  }
   0xd   :  { %s1214_s25 = smov 0  }
   0xe LB: > { %1472 = sst [smem:[#allocation10_spill]] %s1141_s20  ;;  %s1460_s26 = sadd.s32 4294967295, %s1161_s25   ;;  %s1161_s25 = sphi %s1214_s25, %s20_s25   ;;  %s1157_s24 = sphi %s1212_s24, %s1497_s24   ;;  %s1153_s23 = sphi %s1210_s23, %s1496_s23   ;;  %s1149_s22 = sphi %s1208_s22, %s1495_s22   ;;  %s1145_s21 = sphi %s1206_s21, %s1494_s21   ;;  %s1141_s20 = sphi %s1204_s20, %s1493_s20   ;;  %s1137_s19 = sphi %s1202_s19, %s1502_s19   ;;  %s1133_s18 = sphi %s1200_s18, %s1501_s18   ;;  %s1129_s17 = sphi %s1198_s17, %s1500_s17   ;;  %s1125_s16 = sphi %s1196_s16, %s1499_s16   ;;  %s1121_s15 = sphi %s1194_s15, %s1498_s15  }
   0xf   : > { %1473 = sst [smem:[#allocation11_spill]] %s1153_s23  ;;  %s29_s28 = sadd.s32 1, %s1153_s23 }
  0x10   : > { %1474 = sst [smem:[#allocation12_spill]] %s1157_s24  ;;  %s32_s29 = sadd.s32 1, %s1157_s24 }
  0x11   : > { %p30_p0 = scmp.ge.s32.totalorder %s29_s28, 2  ;;  %s125_s30 = sadd.s32 1, %s1141_s20 }
  0x12   : > { %p132_p1 = scmp.ne.s32.totalorder %s1141_s20, %s1137_s19  ;;  %p133_p2 = scmp.eq.s32.totalorder %s1161_s25, 0 }
  0x13   : > { %s1504_s28 = smov (%p30_p0, %s29_s28), 0  ;;  %s1506_s29 = smov (!%p30_p0, %s32_s29), %s1157_s24 }
  0x14   : > { %1475 = sst [smem:[#allocation13_spill]] %s1504_s28  ;;  %p1258_p3 = por %p133_p2, %p132_p1 }
  0x15   : > { %p138_p4 = scmp.ne.s32.totalorder %s1137_s19, %s1133_s18  ;;  %p34_p5 = scmp.ge.s32.totalorder %s1506_s29, 2 }
  0x16   : > { %p139_p6 = scmp.eq.s32.totalorder %s1460_s26, 0  ;;  %s804_s6 = sshll.u32 %s1153_s23, 1 }
  0x17   : > { %s805_s7 = sshll.u32 %s1504_s28, 1  ;;  %s1508_s29 = smov (%p34_p5, %s1506_s29), 0 }
  0x18   : > { %1477 = sst [smem:[#allocation14_spill]] %s1508_s29  ;;  %p1269_p7 = por %p139_p6, %p138_p4 }
  0x19   : > { %s149_s9 = ssub.s32 1, %s804_s6  ;;  %s122_s10 = ssub.s32 %s1157_s24, %s1508_s29 }
  0x1a   : > { %s150_s11 = smul.u32 %s1157_s24, %s149_s9  ;;  %p123_p8 = scmp.eq.s32.totalorder %s122_s10, 0 }
  0x1b   : > { %s153_s12 = ssub.s32 1, %s805_s7  ;;  %s161_s26 = sadd.s32 1, %s1129_s17 }
  0x1c   : > { %s151_s13 = sadd.s32 %s1153_s23, %s150_s11  ;;  %s154_s14 = smul.u32 %s153_s12, %s1508_s29 }
  0x1d   : > { %s1279_s18 = scalar_select %p123_p8, %s1141_s20, %s125_s30  }
  0x1e   : > { %s155_s27 = sadd.s32 %s154_s14, %s1504_s28  ;;  %p171_p9 = scmp.ne.s32.totalorder %s1129_s17, %s1125_s16 }
  0x1f   : > { %1479 = sst [smem:[#allocation15_spill]] %s1279_s18  ;;  %s156_s4 = ssub.s32 %s151_s13, %s155_s27 }
  0x20   : > { %s158_s2 = sor.u32 %s156_s4, %s122_s10  ;;  %s1480_s0 = sadd.s32 4294967295, %s1161_s25  }
  0x21   : > { %p172_p10 = scmp.eq.s32.totalorder %s1480_s0, 3  ;;  %p159_p11 = scmp.eq.s32.totalorder %s158_s2, 0 }
  0x22   : > { %p177_p12 = scmp.ne.s32.totalorder %s1125_s16, %s1121_s15  ;;  %s1482_s7 = sadd.s32 4294967294, %s1161_s25  }
  0x23   : > { %p1289_p13 = por %p172_p10, %p171_p9  ;;  %p178_p0 = scmp.eq.s32.totalorder %s1482_s7, 3 }
  0x24   : > { %s1296_s30 = scalar_select %p159_p11, %s1129_s17, %s161_s26  }
  0x25   : > { %p1298_p1 = por %p178_p0, %p177_p12  ;;  %p882_p2 = scmp.lt.s32.totalorder %s1161_s25, 4 }
  0x26   : > { %s230_s4 = sand.u32 1, %s1141_s20   ;;  %s809_s0 = sshll.u32 %s1157_s24, 7 }
  0x27   : > { %s1483_s9 = scalar_select %p1298_p1, 1, 0 }
  0x28   : > { %s808_s27 = sshll.u32 %s230_s4, 3  ;;  %s1484_s3 = sld [smem:[#allocation18_spill]] }
  0x29   : > { %s234_s12 = scalar_lea.vmem [#allocation4], %s808_s27  ;;  %p1310_p4 = pnand %p882_p2, %p1258_p3 }
  0x2a   : > { %s241_s13 = sshll.u32 %s234_s12, 4  ;;  %p810_p5 = scmp.ge.s32.totalorder %s1161_s25, 1  ;;  %s242_s13 = int_to_ptr.vmem [resolvable:$true] %s241_s13 }
  0x2b   : > { %p246_p6 = scmp.lt.s32.totalorder %s1161_s25, 5  ;;  %s231_s26 = scalar_lea.sflag [#allocation5], %s230_s4 }
  0x2c   : > { %p1015_p8 = pneg %p1310_p4  ;;  %s1026_s7 = scalar_lea.vmem %s242_s13, 128 }
  0x2d   : > { %p1027_p9 = scmp.ne.s32.totalorder %s242_s13, %s1026_s7  ;;  %s1163_s10 = smov [#allocation4]  }
  0x2e   : > { %s239_s11 = scalar_lea.hbm %s1484_s3, %s809_s0  ;;  %s1031_s0 = sshll.u32 %s1163_s10, 4  ;;  %s1032_s0 = int_to_ptr.vmem [resolvable:$false] %s1031_s0 }
  0x2f   : > { %p1029_p10 = pnand %p1027_p9, %p1015_p8  ;;  %s1033_s27 = scalar_lea.vmem %s1032_s0, 256 }
  0x30   : > { %p1034_p12 = scmp.lt.s32.totalorder %s242_s13, %s1032_s0  ;;  %p1035_p0 = scmp.lt.s32.totalorder %s1033_s27, %s1026_s7 }
  0x31   : > { %p1030_p11 = pneg %p1029_p10 }
  0x32   : > { %p1036_p3 = por %p1035_p0, %p1034_p12 }
  0x34   : > { %p1037_p2 = pnand %p1036_p3, %p1030_p11 }
  0x36   : > { %1040 = shalt.err (!%p1037_p2)
}
  0x37   : > { %877 = dma.hbm_to_vmem [thread:$0]  (!%p1310_p4), %s239_s11, 128, %s242_s13, %s231_s26  }
  0x38   : > { %p247_p1 = pnand %p810_p5, %p246_p6 }
  0x39   : > { %s252_s5 = sand.u32 (!%p247_p1), 1, %s1137_s19  }
  0x3a   : > { %250 = sbr.rel (%p247_p1) target bundleno = 423 (0x1a7), region = 36  ;;  %s811_s4 = sshll.u32 (!%p247_p1), %s252_s5, 3 }
  0x3b   : > { %s253_s2 = scalar_lea.sflag (!%p247_p1), [#allocation5], %s252_s5  ;;  %s256_s12 = scalar_lea.vmem (!%p247_p1), [#allocation4], %s811_s4 }
  0x3f   : > { %1112 = dma.done.wait (%p1269_p7), %s253_s2, 128  }
  0x40   : > { %1114 = vsyncadd (%p1269_p7), %s253_s2, 4294967168  ;;  %s1465_s11 = sand.u32 1, %s1125_s16   ;;  %s813_s13 = sshll.u32 %s1145_s21, 1 }
  0x41   : > { %s812_s14 = sshll.u32 %s1465_s11, 4  ;;  %s300_s26 = ssub.s32 1, %s813_s13 }
  0x42   : > { %s301_s7 = smul.u32 %s1149_s22, %s300_s26  ;;  %p313_p1 = scmp.lt.s32.totalorder %s1149_s22, 1 }
  0x43   : > { %s1486_s11 = sld [smem:[#allocation16_spill]]  ;;  %s1349_s20 = scalar_lea.vmem [#allocation7], %s812_s14 }
  0x44   : > { %s1336_s10 = sadd.s32 %s1145_s21, %s301_s7  ;;  %s1487_s7 = sld [smem:[#allocation17_spill]] }
  0x45   : > { %s814_s0 = sshll.u32 %s1336_s10, 2  ;;  %p819_p7 = scmp.ne.s32.totalorder %s1145_s21, 0 }
  0x46   : > { %p304_p4 = scmp.lt.s32.totalorder %s814_s0, 7 }
  0x47   : > { %s314_s8 = scalar_select %p313_p1, %s1149_s22, 1 }
  0x48   : > { %s1510_s0 = smov (!%p304_p4, %s814_s0), 7  ;;  %331 = sbr.rel (%p819_p7) target bundleno = 79 (0x4f), region = 44 }
  0x49   : > { %s851_s27 = sshll.u32 %s314_s8, 4  ;;  %s818_s5 = sshll.u32 %s314_s8, 1 }
  0x4a   : > { %s815_s4 = sshll.u32 %s1510_s0, 2  ;;  %s317_s29 = scalar_lea.vmem %s1456_s1, %s851_s27 }
  0x4b   : > { %s307_s13 = scalar_lea.vmem %s1486_s11, %s815_s4  ;;  %s321_s18 = scalar_lea.vmem %s1487_s7, %s818_s5 }
  0x4d   : > { %v332_v0 = vld [vmem:[%s256_s12] sm:$0xff] }
  0x4e   : > { %333 = vst [vmem:[#allocation2] sm:$0xff] %v332_v0 }
  0x4f PF: > { %v976_v1 = vld [vmem:[%s317_s29 + $0x4] ss:$8 sps:$4 sm:$0xff]   ;;  %v978_v2 = vld [vmem:[%s317_s29] ss:$8 sps:$4 sm:$0xff]   ;;  %v1164_v3 = vmov 0   ;;  %vm372_vm0 = vcmask 130048   ;;  %v342_v6 = vlaneseq }
  0x50   : > { %411 = vmatprep.mubr.bf16.mxu0 %v1164_v3  ;;  %421 = vmatprep.mubr.bf16.mxu1 %v1164_v3  ;;  %v979_v4 = vld [vmem:[%s307_s13] sm:$0xff]   ;;  %v980_v5 = vld [vmem:[%s307_s13 + $0x8] sm:$0xff]   ;;  %p834_p5 = scmp.ne.s32.totalorder %s1149_s22, 0 }
  0x51   : > { %393 = vmatprep.subr.bf16.mxu0 %v976_v1  ;;  %868 = vmatprep.subr.bf16.mxu1 %v976_v1  ;;  %v343_v7 = vshrl.u32 %v342_v6, 7  ;;  %v340_v9 = vld [vmem:[%s321_s18] sm:$0x3] }
  0x52   : > { %394 = vmatpush1.bf16.msra.mxu0 %v978_v2  ;;  %869 = vmatpush1.bf16.msra.mxu1 %v978_v2 }
  0x53   : > { %v344_v8 = vsub.s32 0, %v343_v7  ;;  %v348_v10 = vsub.s32 1, %v343_v7 }
  0x55   : > { %824 = vmatmul.mubr.msk.bf16.vlgmr.msra.gmra.mxu0 %vm372_vm0, %v979_v4  ;;  %825 = vmatmul.mubr.msk.bf16.vlgmr.msra.gmra.mxu1 %vm372_vm0, %v980_v5  ;;  %v345_v11 = vrot.slane %v340_v9, %v344_v8  ;;  %v349_v12 = vrot.slane %v340_v9, %v348_v10 }
 0x115   : > { %v413_v13 = vpop.f32.mrf.mxu0  ;;  %v423_v14 = vpop.f32.mrf.mxu1 }
 0x116   : > { %v414_v15 = vadd.f32 %v413_v13, %v345_v11  ;;  %v424_v16 = vadd.f32 %v423_v14, %v345_v11 }
 0x117   : > { %v415_v17 = vpop.f32.mrf.mxu0  ;;  %v425_v18 = vpop.f32.mrf.mxu1 }
 0x118   : > { %v826_v19 = vmul.f32 -1.442695, %v414_v15  ;;  %v828_v20 = vmul.f32 -1.442695, %v424_v16  ;;  %v416_v21 = vadd.f32 %v415_v17, %v349_v12  ;;  %v1352_v22 = vadd.f32 %v425_v18, %v349_v12 }
 0x119   : > { %v417_v23 = vpop.f32.mrf.mxu0  ;;  %v427_v24 = vpop.f32.mrf.mxu1 }
 0x11a   : > { %981 = vpow2.f32 %v826_v19  ;;  %v830_v25 = vmul.f32 -1.442695, %v416_v21  ;;  %v832_v26 = vmul.f32 -1.442695, %v1352_v22  ;;  %v418_v29 = vadd.f32 %v417_v23, %v345_v11 }
 0x11b   : > { %983 = vpow2.f32 %v828_v20  ;;  %v419_v27 = vpop.f32.mrf.mxu0  ;;  %v429_v28 = vpop.f32.mrf.mxu1  ;;  %v428_v30 = vadd.f32 %v427_v24, %v345_v11  ;;  %v460_v56 = vadd.f32 0.5, %v416_v21  ;;  %vm456_vm1 = vcmp.ge.f32.partialorder %v416_v21, 0.0 }
 0x11c   : > { %985 = vpow2.f32 %v830_v25  ;;  %v1355_v31 = vadd.f32 %v419_v27, %v349_v12  ;;  %v1357_v32 = vadd.f32 %v429_v28, %v349_v12  ;;  %v827_v33 = vmul.f32 -1.442695, %v418_v29 }
 0x11d   : > { %987 = vpow2.f32 %v832_v26  ;;  %v829_v34 = vmul.f32 -1.442695, %v428_v30  ;;  %v462_v59 = vadd.f32 0.5, %v1352_v22  ;;  %vm458_vm2 = vcmp.ge.f32.partialorder %v1352_v22, 0.0 }
 0x11e   : > { %v831_v35 = vmul.f32 -1.442695, %v1355_v31  ;;  %v833_v36 = vmul.f32 -1.442695, %v1357_v32  ;;  %989 = vpow2.f32 %v827_v33  ;;  %v461_v4 = vadd.f32 0.5, %v1355_v31 }
 0x11f   : > { %991 = vpow2.f32 %v829_v34  ;;  %vm457_vm3 = vcmp.ge.f32.partialorder %v1355_v31, 0.0  ;;  %v463_v7 = vadd.f32 0.5, %v1357_v32  ;;  %vm459_vm4 = vcmp.ge.f32.partialorder %v1357_v32, 0.0 }
 0x120   : > { %993 = vpow2.f32 %v831_v35 }
 0x121   : > { %995 = vpow2.f32 %v833_v36 }
 0x127   : > { %v982_v37 = vpop.eup %981 }
 0x128   : > { %v984_v38 = vpop.eup %983  ;;  %v444_v39 = vadd.f32 1.0, %v982_v37 }
 0x129   : > { %v986_v40 = vpop.eup %985  ;;  %v446_v41 = vadd.f32 1.0, %v984_v38 }
 0x12a   : > { %v988_v42 = vpop.eup %987  ;;  %997 = vrcp.f32 %v444_v39  ;;  %v476_v43 = vadd.f32 1.0, %v986_v40 }
 0x12b   : > { %999 = vrcp.f32 %v446_v41  ;;  %v478_v44 = vadd.f32 1.0, %v988_v42  ;;  %v990_v45 = vpop.eup %989 }
 0x12c   : > { %1001 = vrcp.f32 %v476_v43  ;;  %v992_v46 = vpop.eup %991  ;;  %v445_v47 = vadd.f32 1.0, %v990_v45 }
 0x12d   : > { %1003 = vrcp.f32 %v478_v44  ;;  %v994_v48 = vpop.eup %993  ;;  %v447_v49 = vadd.f32 1.0, %v992_v46 }
 0x12e   : > { %v996_v50 = vpop.eup %995  ;;  %1005 = vrcp.f32 %v445_v47  ;;  %v477_v51 = vadd.f32 1.0, %v994_v48 }
 0x12f   : > { %1007 = vrcp.f32 %v447_v49  ;;  %v479_v52 = vadd.f32 1.0, %v996_v50 }
 0x130   : > { %1009 = vrcp.f32 %v477_v51 }
 0x131   : > { %1011 = vrcp.f32 %v479_v52 }
 0x137   : > { %v998_v53 = vpop.eup %997 }
 0x138   : > { %v1000_v54 = vpop.eup %999  ;;  %v492_v55 = vsub.f32 1.0, %v998_v53 }
 0x139   : > { %v1002_v57 = vpop.eup %1001  ;;  %v494_v58 = vsub.f32 1.0, %v1000_v54 }
 0x13a   : > { %v1004_v60 = vpop.eup %1003  ;;  %500 = vst [vmem:[#allocation3 + $0x30] sm:$0xff] %v492_v55  ;;  %v488_v61 = vsel %vm456_vm1, %v460_v56, %v1002_v57 }
 0x13b   : > { %504 = vst [vmem:[#allocation3 + $0x8] sm:$0xff] %v494_v58  ;;  %v496_v62 = vmul.f32 %v998_v53, %v488_v61  ;;  %v490_v63 = vsel %vm458_vm2, %v462_v59, %v1004_v60  ;;  %v1006_v1 = vpop.eup %1005 }
 0x13c   : > { %v498_v0 = vmul.f32 %v1000_v54, %v490_v63  ;;  %v1008_v2 = vpop.eup %1007  ;;  %v493_v3 = vsub.f32 1.0, %v1006_v1 }
 0x13d   : > { %501 = vst [vmem:[#allocation3] sm:$0xff] %v496_v62  ;;  %v1010_v5 = vpop.eup %1009  ;;  %v495_v6 = vsub.f32 1.0, %v1008_v2 }
 0x13e   : > { %505 = vst [vmem:[#allocation3 + $0x20] sm:$0xff] %v498_v0  ;;  %v1012_v8 = vpop.eup %1011  ;;  %502 = vst [vmem:[#allocation3 + $0x18] sm:$0xff] %v493_v3  ;;  %v489_v9 = vsel %vm457_vm3, %v461_v4, %v1010_v5  ;;  %511 = sbr.rel (%p834_p5) target bundleno = 334 (0x14e), region = 48 }
 0x13f   : > { %506 = vst [vmem:[#allocation3 + $0x28] sm:$0xff] %v495_v6  ;;  %v497_v10 = vmul.f32 %v1006_v1, %v489_v9  ;;  %v491_v11 = vsel %vm459_vm4, %v463_v7, %v1012_v8 }
 0x140   : > { %v499_v12 = vmul.f32 %v1008_v2, %v491_v11 }
 0x141   : > { %503 = vst [vmem:[#allocation3 + $0x10] sm:$0xff] %v497_v10 }
 0x142   : > { %507 = vst [vmem:[#allocation3 + $0x38] sm:$0xff] %v499_v12 }
 0x143   : > { %v512_v13 = vld [vmem:[#allocation3 + $0x30] sm:$0xff]  ;;  %v516_v19 = vld [vmem:[#allocation3 + $0x8] sm:$0xff] }
 0x144   : > { %v513_v14 = vld [vmem:[#allocation3] sm:$0xff] }
 0x145   : > { %v514_v15 = vld [vmem:[#allocation3 + $0x18] sm:$0xff]  ;;  %v517_v20 = vld [vmem:[#allocation3 + $0x20] sm:$0xff] }
 0x146   : > { %v524_v16 = vmul.f32 %v514_v15, %v512_v13  ;;  %v527_v17 = vmul.f32 %v514_v15, %v513_v14  ;;  %v525_v21 = vmul.f32 %v516_v19, %v514_v15  ;;  %v522_v23 = vld [vmem:[#allocation3 + $0x28] sm:$0xff] }
 0x147   : > { %v526_v26 = vmul.f32 %v522_v23, %v516_v19  ;;  %v529_v27 = vmul.f32 %v522_v23, %v517_v20 }
 0x148   : > { %v515_v18 = vld [vmem:[#allocation3 + $0x10] sm:$0xff]  ;;  %533 = vst [vmem:[#allocation3 + $0x18] sm:$0xff] %v524_v16  ;;  %535 = vst [vmem:[#allocation3 + $0x8] sm:$0xff] %v525_v21 }
 0x149   : > { %v528_v22 = vmul.f32 %v516_v19, %v515_v18  ;;  %v523_v24 = vld [vmem:[#allocation3 + $0x38] sm:$0xff]  ;;  %v530_v25 = vadd.f32 %v527_v17, %v515_v18  ;;  %537 = vst [vmem:[#allocation3 + $0x28] sm:$0xff] %v526_v26 }
 0x14a   : > { %v532_v29 = vadd.f32 %v529_v27, %v523_v24 }
 0x14b   : > { %v531_v28 = vadd.f32 %v528_v22, %v517_v20  ;;  %534 = vst [vmem:[#allocation3 + $0x10] sm:$0xff] %v530_v25 }
 0x14c   : > { %538 = vst [vmem:[#allocation3 + $0x38] sm:$0xff] %v532_v29 }
 0x14d   : > { %536 = vst [vmem:[#allocation3 + $0x20] sm:$0xff] %v531_v28 }
 0x14e PF: > { %p835_p6 = scmp.ne.s32.totalorder %s1149_s22, 1 }
 0x150   : > { %542 = sbr.rel (%p835_p6) target bundleno = 349 (0x15d), region = 52 }
 0x155   : > { %v543_v30 = vld [vmem:[#allocation3 + $0x30] sm:$0xff]  ;;  %v549_v31 = vld [vmem:[#allocation3 + $0x18] sm:$0xff]  ;;  %v544_v32 = vld [vmem:[#allocation3] sm:$0xff] }
 0x156   : > { %v555_v33 = vmul.f32 %v549_v31, %v543_v30  ;;  %v550_v34 = vld [vmem:[#allocation3 + $0x10] sm:$0xff]  ;;  %v551_v35 = vld [vmem:[#allocation3 + $0x8] sm:$0xff]  ;;  %v552_v36 = vld [vmem:[#allocation3 + $0x20] sm:$0xff] }
 0x157   : > { %v558_v37 = vmul.f32 %v550_v34, %v543_v30  ;;  %v556_v38 = vmul.f32 %v551_v35, %v549_v31  ;;  %v559_v39 = vmul.f32 %v552_v36, %v549_v31  ;;  %v553_v40 = vld [vmem:[#allocation3 + $0x28] sm:$0xff]  ;;  %v554_v41 = vld [vmem:[#allocation3 + $0x38] sm:$0xff] }
 0x158   : > { %564 = vst [vmem:[#allocation3 + $0x30] sm:$0xff] %v555_v33  ;;  %v557_v42 = vmul.f32 %v553_v40, %v551_v35  ;;  %v560_v43 = vmul.f32 %v554_v41, %v551_v35 }
 0x159   : > { %v561_v44 = vadd.f32 %v558_v37, %v544_v32  ;;  %566 = vst [vmem:[#allocation3 + $0x18] sm:$0xff] %v556_v38  ;;  %v562_v45 = vadd.f32 %v559_v39, %v550_v34 }
 0x15a   : > { %568 = vst [vmem:[#allocation3 + $0x8] sm:$0xff] %v557_v42  ;;  %v563_v46 = vadd.f32 %v560_v43, %v552_v36 }
 0x15b   : > { %565 = vst [vmem:[#allocation3] sm:$0xff] %v561_v44  ;;  %567 = vst [vmem:[#allocation3 + $0x10] sm:$0xff] %v562_v45 }
 0x15c   : > { %569 = vst [vmem:[#allocation3 + $0x20] sm:$0xff] %v563_v46 }
 0x15d PF: > { %572 = sbr.rel (%p834_p5) target bundleno = 362 (0x16a), region = 56 }
 0x162   : > { %v573_v47 = vld [vmem:[#allocation3 + $0x30] sm:$0xff]  ;;  %v577_v48 = vld [vmem:[#allocation3 + $0x8] sm:$0xff]  ;;  %v574_v49 = vld [vmem:[#allocation3] sm:$0xff] }
 0x163   : > { %v581_v50 = vmul.f32 %v577_v48, %v573_v47  ;;  %v578_v51 = vld [vmem:[#allocation3 + $0x20] sm:$0xff]  ;;  %v583_v52 = vmul.f32 %v577_v48, %v574_v49  ;;  %v575_v53 = vld [vmem:[#allocation3 + $0x18] sm:$0xff]  ;;  %v579_v54 = vld [vmem:[#allocation3 + $0x28] sm:$0xff] }
 0x164   : > { %v582_v55 = vmul.f32 %v579_v54, %v575_v53  ;;  %v576_v56 = vld [vmem:[#allocation3 + $0x10] sm:$0xff]  ;;  %v580_v57 = vld [vmem:[#allocation3 + $0x38] sm:$0xff] }
 0x165   : > { %587 = vst [vmem:[#allocation3 + $0x8] sm:$0xff] %v581_v50  ;;  %v585_v58 = vadd.f32 %v583_v52, %v578_v51  ;;  %v584_v59 = vmul.f32 %v579_v54, %v576_v56 }
 0x166   : > { %589 = vst [vmem:[#allocation3 + $0x28] sm:$0xff] %v582_v55 }
 0x167   : > { %588 = vst [vmem:[#allocation3 + $0x20] sm:$0xff] %v585_v58  ;;  %v586_v60 = vadd.f32 %v584_v59, %v580_v57 }
 0x169   : > { %590 = vst [vmem:[#allocation3 + $0x38] sm:$0xff] %v586_v60 }
 0x16a PF: > { %593 = sbr.rel (%p835_p6) target bundleno = 375 (0x177), region = 60 }
 0x16f   : > { %v594_v61 = vld [vmem:[#allocation3 + $0x30] sm:$0xff]  ;;  %v598_v62 = vld [vmem:[#allocation3 + $0x8] sm:$0xff]  ;;  %v595_v63 = vld [vmem:[#allocation3] sm:$0xff] }
 0x170   : > { %v602_v0 = vmul.f32 %v598_v62, %v594_v61  ;;  %v599_v1 = vld [vmem:[#allocation3 + $0x20] sm:$0xff]  ;;  %v596_v2 = vld [vmem:[#allocation3 + $0x18] sm:$0xff]  ;;  %v600_v3 = vld [vmem:[#allocation3 + $0x28] sm:$0xff] }
 0x171   : > { %v604_v4 = vmul.f32 %v599_v1, %v594_v61  ;;  %v603_v5 = vmul.f32 %v600_v3, %v596_v2  ;;  %v597_v6 = vld [vmem:[#allocation3 + $0x10] sm:$0xff]  ;;  %v601_v7 = vld [vmem:[#allocation3 + $0x38] sm:$0xff] }
 0x172   : > { %608 = vst [vmem:[#allocation3 + $0x30] sm:$0xff] %v602_v0  ;;  %v605_v8 = vmul.f32 %v601_v7, %v596_v2 }
 0x173   : > { %v606_v9 = vadd.f32 %v604_v4, %v595_v63  ;;  %610 = vst [vmem:[#allocation3 + $0x18] sm:$0xff] %v603_v5 }
 0x174   : > { %v607_v10 = vadd.f32 %v605_v8, %v597_v6 }
 0x175   : > { %609 = vst [vmem:[#allocation3] sm:$0xff] %v606_v9 }
 0x176   : > { %611 = vst [vmem:[#allocation3 + $0x10] sm:$0xff] %v607_v10 }
 0x177 PF: > { %v620_v15 = vld [vmem:[#allocation2] sm:$0xff]  ;;  %v616_v16 = vld [vmem:[#allocation3 + $0x8] sm:$0xff]  ;;  %v617_v19 = vld [vmem:[#allocation3 + $0x20] sm:$0xff] }
 0x178   : > { %v618_v20 = vld [vmem:[#allocation3 + $0x28] sm:$0xff]  ;;  %v619_v21 = vld [vmem:[#allocation3 + $0x38] sm:$0xff]  ;;  %v623_v22 = vmul.f32 %v620_v15, %v616_v16 }
 0x179   : > { %v612_v11 = vld [vmem:[#allocation3 + $0x30] sm:$0xff]  ;;  %v624_v23 = vmul.f32 %v620_v15, %v618_v20 }
 0x17a   : > { %v614_v13 = vld [vmem:[#allocation3 + $0x18] sm:$0xff]  ;;  %v621_v17 = vmul.f32 %v620_v15, %v612_v11  ;;  %v627_v26 = vadd.f32 %v623_v22, %v617_v19 }
 0x17b   : > { %v622_v18 = vmul.f32 %v620_v15, %v614_v13  ;;  %v628_v27 = vadd.f32 %v624_v23, %v619_v21 }
 0x17c   : > { %v613_v12 = vld [vmem:[#allocation3] sm:$0xff] }
 0x17d   : > { %v615_v14 = vld [vmem:[#allocation3 + $0x10] sm:$0xff]  ;;  %v625_v24 = vadd.f32 %v621_v17, %v613_v12  ;;  %v865_v29 = vpack.c.bf16 %v628_v27, %v627_v26 }
 0x17e   : > { %v626_v25 = vadd.f32 %v622_v18, %v615_v14  ;;  %651 = sbr.rel (%p834_p5) target bundleno = 388 (0x184), region = 64 }
 0x17f   : > { %867 = vst [vmem:[%s1349_s20 + $0x8] sm:$0xff] %v865_v29  }
 0x180   : > { %v860_v28 = vpack.c.bf16 %v626_v25, %v625_v24 }
 0x182   : > { %861 = vst [vmem:[%s1349_s20] sm:$0xff] %v860_v28  }
 0x183   : > { %652 = vst [vmem:[#allocation2] sm:$0xff] %v628_v27 }
 0x184 PF: > { %655 = sbr.rel (%p835_p6) target bundleno = 394 (0x18a), region = 68 }
 0x189   : > { %656 = vst [vmem:[#allocation2] sm:$0xff] %v625_v24 }
 0x18a PF: > { %s856_s3 = sshll.u32 %s1336_s10, 3  ;;  %s677_s23 = sshll.u32 %s1349_s20, 4  ;;  %s1386_s23 = int_to_ptr.vmem [resolvable:$true] %s677_s23 }
 0x18b   : > { %s674_s21 = sadd.s32 %s1149_s22, %s856_s3  ;;  %s1488_s18 = sld [smem:[#allocation19_spill]] }
 0x18c   : > { %s848_s24 = sshll.u32 %s674_s21, 6  ;;  %s1490_s14 = sand.u32 1, %s1125_s16  }
 0x18d   : > { %s1395_s0 = scalar_lea.sflag [#allocation6], %s1490_s14  ;;  %s1041_s8 = scalar_lea.vmem %s1386_s23, 256 }
 0x18e   : > { %p1042_p8 = scmp.ne.s32.totalorder %s1386_s23, %s1041_s8  ;;  %s1165_s20 = smov [#allocation7]  }
 0x18f   : > { %s1045_s22 = sshll.u32 %s1165_s20, 4  ;;  %s1046_s22 = int_to_ptr.vmem [resolvable:$false] %s1045_s22 }
 0x190   : > { %p1043_p9 = pnand %p1042_p8, %p1289_p13  ;;  %s1047_s10 = scalar_lea.vmem %s1046_s22, 512 }
 0x191   : > { %s1489_s12 = smov %s1488_s18  ;;  %s1391_s11 = scalar_lea.hbm %s1488_s18, %s848_s24 }
 0x192   : > { %p1044_p10 = pneg %p1043_p9  ;;  %p1048_p11 = scmp.lt.s32.totalorder %s1386_s23, %s1046_s22 }
 0x193   : > { %p1049_p12 = scmp.lt.s32.totalorder %s1047_s10, %s1041_s8 }
 0x195   : > { %p1050_p0 = por %p1049_p12, %p1048_p11 }
 0x197   : > { %p1051_p3 = pnand %p1050_p0, %p1044_p10 }
 0x199   : > { %1054 = shalt.err (!%p1051_p3)
}
 0x19a   : > { %s1055_s27 = scalar_lea.hbm %s1391_s11, 256  ;;  %s1059_s2 = scalar_lea.hbm %s1489_s12, 1024 }
 0x19b   : > { %p1056_p2 = scmp.ne.s32.totalorder %s1391_s11, %s1055_s27  ;;  %p1060_p7 = scmp.lt.s32.totalorder %s1391_s11, %s1489_s12 }
 0x19c   : > { %p1061_p5 = scmp.lt.s32.totalorder %s1059_s2, %s1055_s27 }
 0x19d   : > { %p1057_p1 = pnand %p1056_p2, %p1289_p13 }
 0x19e   : > { %p1062_p6 = por %p1061_p5, %p1060_p7 }
 0x19f   : > { %p1058_p4 = pneg %p1057_p1 }
 0x1a1   : > { %p1063_p8 = pnand %p1062_p6, %p1058_p4 }
 0x1a3   : > { %1066 = shalt.err (!%p1063_p8)
}
 0x1a4   : > { %s1166_s7 = smov 64   ;;  %s1167_s3 = smov 128  }
 0x1a5   : > { %s1168_s21 = smov 4  }
 0x1a6   : > { %872 = dma.vmem_to_hbm [thread:$0]  (%p1289_p13), %s1386_s23, 256, %s1391_s11, %s1395_s0, %s1166_s7, %s1167_s3, %s1168_s21  }
 0x1a7 PF: > { %p883_p9 = scmp.ge.s32.totalorder %s1161_s25, 2  ;;  %s692_s24 = sand.u32 1, %s1121_s15  }
 0x1a8   : > { %p1491_p10 = scmp.ne.s32.totalorder %s1483_s9, 0  ;;  %s693_s28 = scalar_lea.sflag [#allocation6], %s692_s24 }
 0x1aa   : > { %p879_p11 = pnand %p883_p9, %p1491_p10 }
 0x1ac   : > { %p880_p12 = pneg %p879_p11 }
 0x1ae   : > { %1116 = dma.done.wait (%p880_p12), %s693_s28, 256  }
 0x1af   : > { %1118 = vsyncadd (%p880_p12), %s693_s28, 4294967040  ;;  %s20_s25 = sadd.s32 1, %s1161_s25   ;;  %s1492_s6 = sld [smem:[#allocation10_spill]] }
 0x1b0   : > { %p17_p0 = scmp.ge.s32.totalorder %s20_s25, 6   ;;  %s1493_s20 = sld [smem:[#allocation15_spill]] }
 0x1b1   : > { %s1494_s21 = sld [smem:[#allocation11_spill]]  ;;  %s1498_s15 = smov %s1125_s16 }
 0x1b2   : > { %s1495_s22 = sld [smem:[#allocation12_spill]]  ;;  %s1499_s16 = smov %s1129_s17 }
 0x1b3   : > { %s1496_s23 = sld [smem:[#allocation13_spill]]  ;;  %s1500_s17 = smov %s1296_s30 }
 0x1b4   : > { %s1497_s24 = sld [smem:[#allocation14_spill]]  ;;  %s1501_s18 = smov %s1137_s19 }
 0x1b5   : > { %s1502_s19 = smov %s1492_s6  ;;  %19 = sbr.rel (!%p17_p0) target bundleno = 14 (0xe), region = 118 }
 0x1ba   :  { %698 = vsyncpa [#allocation5], 1 }
 0x1bb   :  { %700 = vsyncpa [#allocation5 + $0x1], 1 }
 0x1bc   :  { %701 = vsyncpa [#allocation6], 1 }
 0x1bd   :  { %703 = vsyncpa [#allocation6 + $0x1], 1 }

</bundles_post_ra>
